<compile_context>
chip_gen: v6e
topology: v6e:2x2x1
jax: 0.10.0
libtpu: 0.0.40
codegen_flags: <defaults>
</compile_context>

<pallas_src>
import math

import numpy as np

import jax
import jax.numpy as jnp
from jax.experimental import pallas as pl
from jax.experimental.pallas import tpu as pltpu


# -----------------------------------------------------------------------------
# Zero-traffic identity: no-op body, operands stay in HBM, output aliases input.
# -----------------------------------------------------------------------------
def _noop_identity_kernel(x_ref, o_ref):
    # Intentionally empty: with input_output_aliases={0: 0} the output HBM
    # buffer IS the input buffer, so leaving it untouched is the identity.
    # No HBM<->VMEM DMA is generated (memory_space=pl.ANY, no auto-tiling).
    pass


def _identity_inplace_impl(x):
    return pl.pallas_call(
        _noop_identity_kernel,
        out_shape=jax.ShapeDtypeStruct(x.shape, x.dtype),
        in_specs=[pl.BlockSpec(memory_space=pl.ANY)],
        out_specs=pl.BlockSpec(memory_space=pl.ANY),
        input_output_aliases={0: 0},
    )(x)


# Donation is what makes the alias truly zero-copy (otherwise XLA inserts a
# defensive copy of the non-donated parameter before the custom call).
_identity_inplace = jax.jit(_identity_inplace_impl, donate_argnums=0)


# -----------------------------------------------------------------------------
# Copy fallback (no donation available): lane-dense tiled HBM->VMEM->HBM copy.
# -----------------------------------------------------------------------------
def _copy_kernel(x_ref, o_ref):
    o_ref[...] = x_ref[...]


_LANE_CANDIDATES = (2048, 1024, 512, 256, 128)


def _sublane_for(dtype):
    # Packed-tile alignment: 8 rows/sublane-tile for 4-byte, 16 for 2-byte,
    # 32 for 1-byte dtypes.
    return {4: 8, 2: 16, 1: 32}.get(jnp.dtype(dtype).itemsize, 8)


def _chip_budgets():
    """Per-chip (block_byte_budget, vmem_limit_bytes), derived from VMEM size."""
    try:
        vmem_bytes = int(pltpu.get_tpu_info().vmem_capacity_bytes)
    except Exception:
        vmem_bytes = 64 * 1024 * 1024  # conservative (v7x-sized) default
    # Request at most half of physical VMEM as the scoped limit.
    vmem_limit = max(16 * 1024 * 1024, min(vmem_bytes // 2, 96 * 1024 * 1024))
    # Working set = (in + out) x default Buffered(2) = 4x block bytes, plus
    # Mosaic internal scratch -> keep block <= vmem_limit / 8, capped at 8 MiB.
    block_budget = max(512 * 1024, min(8 * 1024 * 1024, vmem_limit // 8))
    return block_budget, vmem_limit


@jax.jit
def _identity_copy(x):
    orig_shape = x.shape
    total = math.prod(orig_shape)
    itemsize = jnp.dtype(x.dtype).itemsize
    sublane = _sublane_for(x.dtype)
    block_budget, vmem_limit = _chip_budgets()

    # Lane-dense flat layout; pad the flat tail to a multiple of 128 lanes if
    # needed (keeps stores full-width instead of masked vst.msk).
    lane = None
    for cand in _LANE_CANDIDATES:
        if total % cand == 0:
            lane = cand
            break
    xf = x.reshape(-1)
    pad = 0
    if lane is None:
        lane = 128
        padded = pl.cdiv(total, lane) * lane
        pad = padded - total
        xf = jnp.pad(xf, (0, pad))
    rows = xf.shape[0] // lane
    x2 = xf.reshape(rows, lane)

    # Fixed sublane-aligned block_rows + cdiv grid (Pallas masks the ragged
    # last block) -> VMEM stays bounded for any shape.
    budget_rows = max(
        sublane, (block_budget // (lane * itemsize)) // sublane * sublane
    )
    block_rows = rows if rows <= budget_rows else budget_rows
    # If a large tensor landed in a single block, split it so >=2 grid steps
    # exist and both v7x TensorCores can drive their own DMAs.
    if (
        block_rows == rows
        and rows >= 2 * sublane
        and rows * lane * itemsize >= (1 << 21)
    ):
        block_rows = pl.cdiv(pl.cdiv(rows, 2), sublane) * sublane
    grid = pl.cdiv(rows, block_rows)

    y2 = pl.pallas_call(
        _copy_kernel,
        out_shape=jax.ShapeDtypeStruct((rows, lane), x.dtype),
        grid=(grid,),
        in_specs=[pl.BlockSpec((block_rows, lane), lambda i: (i, 0))],
        out_specs=pl.BlockSpec((block_rows, lane), lambda i: (i, 0)),
        # No input_output_aliases here: without donation an alias only forces
        # an extra defensive copy.
        compiler_params=pltpu.CompilerParams(
            dimension_semantics=("parallel",),
            vmem_limit_bytes=vmem_limit,
        ),
    )(x2)

    yf = y2.reshape(-1)
    if pad:
        yf = yf[:total]
    return yf.reshape(orig_shape)


# -----------------------------------------------------------------------------
# Module interface (mirrors the PyTorch abstract class).
# -----------------------------------------------------------------------------
class Encoder:
    """Base encoder interface for the encoder-decoder architecture."""

    def __init__(self, **kwargs):
        # No parameters are declared by the PyTorch module's __init__.
        pass

    def forward(self, X, *args):
        raise NotImplementedError

    def __call__(self, X, *args):
        return self.forward(X, *args)


class PallasIdentityEncoder(Encoder):
    """Concrete encoder whose (trivial) forward runs as a Pallas TPU kernel.

    donate=True  -> zero-HBM-traffic in-place identity (input buffer is
                    donated; the returned array aliases it).
    donate=False -> non-aliased lane-dense tiled copy (input stays valid).
    """

    def __init__(self, donate=True, **kwargs):
        super().__init__(**kwargs)
        self._donate = donate

    def forward(self, X, *args):
        if self._donate:
            return _identity_inplace(X)
        return _identity_copy(X)


if __name__ == "__main__":
    key = jax.random.PRNGKey(0)
    k1, k2 = jax.random.split(key)

    # Small NCHW input consistent with a conv-style encoder interface.
    x = jax.random.normal(k1, (2, 4, 16, 16), dtype=jnp.float32)
    expected = np.asarray(jax.device_get(x))   # host copy before donation
    x_shape, x_dtype = x.shape, x.dtype

    # Faithful check: the base interface raises NotImplementedError.
    base = Encoder()
    try:
        base(x)
        raise RuntimeError("base Encoder.forward should have raised")
    except NotImplementedError:
        pass

    # 1) Zero-traffic in-place identity (donates x; do not reuse x after this).
    enc = PallasIdentityEncoder(donate=True)
    y = jax.block_until_ready(enc(x))
    assert y.shape == x_shape and y.dtype == x_dtype
    assert np.array_equal(np.asarray(jax.device_get(y)), expected)

    # 2) Non-donating lane-dense copy path on an independent input.
    x2 = jax.random.normal(k2, (2, 4, 16, 16), dtype=jnp.float32)
    expected2 = np.asarray(jax.device_get(x2))
    enc_copy = PallasIdentityEncoder(donate=False)
    y2 = jax.block_until_ready(enc_copy(x2))
    assert y2.shape == x2.shape and y2.dtype == x2.dtype
    assert np.array_equal(np.asarray(jax.device_get(y2)), expected2)

    print("KERNEL_OK")
</pallas_src>

<mosaic_0001>
module attributes {stable_mosaic.version = 11 : i64} {
  func.func @_noop_identity_kernel(%arg0: memref<2x4x16x16xf32, #tpu.memory_space<any>>, %arg1: memref<2x4x16x16xf32, #tpu.memory_space<any>>) attributes {dimension_semantics = [], scalar_prefetch = 0 : i64, scratch_operands = 0 : i64, tpu.core_type = #tpu.core_type<tc>} {
    return
  }
}

</mosaic_0001>

<bundles_post_ra>
// kernel: _identity_inplace_impl.1
= control target key start
LH: loop header
LB: loop body
LE: loop exit
PB: predicated region body
PF: predicated region fallthrough
CT: control target
= control target key end

     0   :  { %s16_s0 = inlined_call_operand.hbm [shape: f32[2,4,16,16], index: 0, kind: input, shape index: {}, may-alias: {0,1}]   ;;  %s17_s1 = inlined_call_operand.hbm [shape: f32[2,4,16,16], index: 1, kind: output, shape index: {}, may-alias: {0,1}]  }

</bundles_post_ra>
